<compile_context>
chip_gen: v7x
topology: tpu7x:2x2x1
jax: 0.10.0
libtpu: 0.0.40
codegen_flags: <defaults>
</compile_context>

<pallas_src>
import functools

import jax
import jax.numpy as jnp
from jax.experimental import pallas as pl
from jax.experimental.pallas import tpu as pltpu


def _round_up(x, m):
    return ((x + m - 1) // m) * m


def _mlp_kernel(x_ref, w1_ref, b1_ref, w2_ref, b2_ref, w3_ref, b3_ref, o_ref):
    # Cast the f32 activation tile to bf16 in-kernel (MXU operand dtype).
    x = x_ref[...].astype(w1_ref.dtype)
    # fc1 + ReLU  (bf16 operands, f32 accumulation / elementwise epilogue)
    h1 = jnp.dot(x, w1_ref[...], preferred_element_type=jnp.float32)
    h1 = jnp.maximum(h1 + b1_ref[...], 0.0)
    # fc2 + ReLU
    h2 = jnp.dot(h1.astype(w2_ref.dtype), w2_ref[...],
                 preferred_element_type=jnp.float32)
    h2 = jnp.maximum(h2 + b2_ref[...], 0.0)
    # fc3 (no activation); output dim is the real action_dim (unpadded).
    out = jnp.dot(h2.astype(w3_ref.dtype), w3_ref[...],
                  preferred_element_type=jnp.float32)
    o_ref[...] = (out + b3_ref[...]).astype(o_ref.dtype)
    # TODO(synk): if bundle dumps ever show ld/st (spill) saturation at very
    # large TB, add an inner lax.fori_loop(unroll=True) over 256-row sub-slices
    # of x_ref/o_ref to bound live h1/h2 intermediates.


def prepare_params(params, compute_dtype=jnp.bfloat16):
    """Zero-pad *hidden* feature dims to multiples of 128 lanes and cast
    weights to the MXU compute dtype.  The final output dim (action_dim) is
    left UNPADDED so the kernel's HBM writeback is only the real columns.
    Biases stay f32 (added post-accumulation).  Do this ONCE."""
    def pad_to(a, shape):
        return jnp.pad(a, [(0, t - s) for s, t in zip(a.shape, shape)])

    k = params["w1"].shape[0]
    h1 = params["w1"].shape[1]
    h2 = params["w2"].shape[1]
    a = params["w3"].shape[1]
    h1p, h2p = _round_up(h1, 128), _round_up(h2, 128)

    return {
        "w1": pad_to(params["w1"], (k, h1p)).astype(compute_dtype),
        "b1": pad_to(params["b1"], (1, h1p)).astype(jnp.float32),
        "w2": pad_to(params["w2"], (h1p, h2p)).astype(compute_dtype),
        "b2": pad_to(params["b2"], (1, h2p)).astype(jnp.float32),
        "w3": pad_to(params["w3"], (h2p, a)).astype(compute_dtype),   # out dim unpadded
        "b3": params["b3"].astype(jnp.float32),                       # (1, action_dim)
    }


@functools.partial(jax.jit, static_argnames=("tb",))
def mlp_forward(x, prepared, *, tb=2048):
    """x: (B, state_dim) float32; prepared: output of prepare_params."""
    w1, b1 = prepared["w1"], prepared["b1"]
    w2, b2 = prepared["w2"], prepared["b2"]
    w3, b3 = prepared["w3"], prepared["b3"]

    B, K = x.shape
    H1p, H2p = w1.shape[1], w2.shape[1]
    A = w3.shape[1]                       # real action_dim (unpadded)

    # Batch tile: multiple of 16 sublanes; capped at ceil(B/2) so the grid has
    # at least 2 steps when possible (keeps both v7x TensorCores busy).
    sub = 16
    TB = max(sub, min(tb, _round_up(pl.cdiv(B, 2), sub)))
    Bp = _round_up(B, TB)

    xp = x if Bp == B else jnp.pad(x, ((0, Bp - B), (0, 0)))
    grid = (Bp // TB,)

    weight_bytes = sum(p.size * p.dtype.itemsize
                       for p in (w1, b1, w2, b2, w3, b3))
    flops = 2 * Bp * (K * H1p + H1p * H2p + H2p * A)
    bytes_accessed = xp.size * xp.dtype.itemsize + weight_bytes + Bp * A * 4

    # Explicit VMEM budget with headroom (v5e scoped default is 16 MiB,
    # v7x physical is 64 MiB — cap well below that).
    vmem_limit_bytes = int(min(
        48 * 1024 * 1024,
        weight_bytes                       # resident weights/biases (single-buffered)
        + 2 * TB * K * 4                   # double-buffered f32 x tiles
        + 2 * TB * A * 4                   # double-buffered f32 out tiles
        + 4 * TB * max(H1p, H2p) * 4       # f32 h1/h2 live intermediates (+slack)
        + (8 << 20)))                      # compiler scratch headroom

    resident = dict(pipeline_mode=pl.Buffered(1))   # constant index_map -> 1 buffer

    out = pl.pallas_call(
        _mlp_kernel,
        out_shape=jax.ShapeDtypeStruct((Bp, A), jnp.float32),
        grid=grid,
        in_specs=[
            pl.BlockSpec((TB, K), lambda i: (i, 0)),              # x: tiled over batch
            pl.BlockSpec(w1.shape, lambda i: (0, 0), **resident),  # weights/biases stay
            pl.BlockSpec(b1.shape, lambda i: (0, 0), **resident),  # VMEM-resident
            pl.BlockSpec(w2.shape, lambda i: (0, 0), **resident),
            pl.BlockSpec(b2.shape, lambda i: (0, 0), **resident),
            pl.BlockSpec(w3.shape, lambda i: (0, 0), **resident),
            pl.BlockSpec(b3.shape, lambda i: (0, 0), **resident),
        ],
        out_specs=pl.BlockSpec((TB, A), lambda i: (i, 0)),
        compiler_params=pltpu.CompilerParams(
            dimension_semantics=("parallel",),
            vmem_limit_bytes=vmem_limit_bytes,
        ),
        cost_estimate=pl.CostEstimate(
            flops=flops, transcendentals=0, bytes_accessed=bytes_accessed),
    )(xp, w1, b1, w2, b2, w3, b3)

    # Only padded batch rows need slicing off; output width is already exact.
    return out[:B] if Bp != B else out


def init_mlp_params(key, state_dim, action_dim, hidden_dim=50):
    """PyTorch nn.Linear-style init (uniform +-1/sqrt(fan_in)).
    Weights stored (in_features, out_features); biases (1, out_features)."""
    dims = [(state_dim, hidden_dim), (hidden_dim, hidden_dim * 2),
            (hidden_dim * 2, action_dim)]
    params = {}
    for i, (fan_in, fan_out) in enumerate(dims, start=1):
        key, kw, kb = jax.random.split(key, 3)
        bound = 1.0 / jnp.sqrt(jnp.float32(fan_in))
        params[f"w{i}"] = jax.random.uniform(
            kw, (fan_in, fan_out), jnp.float32, minval=-bound, maxval=bound)
        params[f"b{i}"] = jax.random.uniform(
            kb, (1, fan_out), jnp.float32, minval=-bound, maxval=bound)
    return params


def mlp_reference(x, params, compute_dtype=jnp.float32):
    """Pure-JAX reference; compute_dtype emulates the kernel's bf16 operand
    cast (accumulation still f32)."""
    def lin(h, w, b):
        return jnp.dot(h.astype(compute_dtype), w.astype(compute_dtype),
                       preferred_element_type=jnp.float32) + b
    h1 = jnp.maximum(lin(x, params["w1"], params["b1"]), 0.0)
    h2 = jnp.maximum(lin(h1, params["w2"], params["b2"]), 0.0)
    return lin(h2, params["w3"], params["b3"])


if __name__ == "__main__":
    key = jax.random.PRNGKey(0)
    state_dim, action_dim, hidden_dim = 8, 4, 50
    batch = 2  # tiny demo shape; throughput shows up at B >= a few thousand

    kx, kp = jax.random.split(key)
    x = jax.random.normal(kx, (batch, state_dim), jnp.float32)
    params = init_mlp_params(kp, state_dim, action_dim, hidden_dim)
    prepared = prepare_params(params)   # pad hidden dims + bf16 cast, once

    out = mlp_forward(x, prepared)
    out = jax.block_until_ready(out)

    assert out.shape == (batch, action_dim), out.shape
    # Match a reference using the same bf16 operand cast (tight tolerance) ...
    ref_bf16 = mlp_reference(x, params, compute_dtype=jnp.bfloat16)
    assert jnp.allclose(out, ref_bf16, atol=2e-3, rtol=2e-3), (out, ref_bf16)
    # ... and stay close to the full-f32 reference (bf16 operand error only).
    ref_f32 = mlp_reference(x, params, compute_dtype=jnp.float32)
    assert jnp.allclose(out, ref_f32, atol=3e-2, rtol=3e-2), (out, ref_f32)

    print("KERNEL_OK")
</pallas_src>

<mosaic_0001>
module attributes {stable_mosaic.version = 11 : i64} {
  func.func @_mlp_kernel(%arg0: i32, %arg1: memref<16x8xf32, #tpu.memory_space<vmem>>, %arg2: memref<8x128xbf16, #tpu.memory_space<vmem>>, %arg3: memref<1x128xf32, #tpu.memory_space<vmem>>, %arg4: memref<128x128xbf16, #tpu.memory_space<vmem>>, %arg5: memref<1x128xf32, #tpu.memory_space<vmem>>, %arg6: memref<128x4xbf16, #tpu.memory_space<vmem>>, %arg7: memref<1x4xf32, #tpu.memory_space<vmem>>, %arg8: memref<16x4xf32, #tpu.memory_space<vmem>>) attributes {dimension_semantics = [#tpu.dimension_semantics<parallel>], iteration_bounds = array<i64: 1>, scalar_prefetch = 0 : i64, scratch_operands = 0 : i64, tpu.core_type = #tpu.core_type<tc>, window_params = [{transform_indices = @transform_0, window_bounds = array<i64: 16, 8>}, {pipeline_mode = #tpu.pipeline_mode<synchronous>, transform_indices = @transform_1, window_bounds = array<i64: 8, 128>}, {pipeline_mode = #tpu.pipeline_mode<synchronous>, transform_indices = @transform_2, window_bounds = array<i64: 1, 128>}, {pipeline_mode = #tpu.pipeline_mode<synchronous>, transform_indices = @transform_3, window_bounds = array<i64: 128, 128>}, {pipeline_mode = #tpu.pipeline_mode<synchronous>, transform_indices = @transform_4, window_bounds = array<i64: 1, 128>}, {pipeline_mode = #tpu.pipeline_mode<synchronous>, transform_indices = @transform_5, window_bounds = array<i64: 128, 4>}, {pipeline_mode = #tpu.pipeline_mode<synchronous>, transform_indices = @transform_6, window_bounds = array<i64: 1, 4>}, {transform_indices = @transform_7, window_bounds = array<i64: 16, 4>}]} {
    %c0 = arith.constant 0 : index
    %c0_0 = arith.constant 0 : index
    %0 = vector.load %arg1[%c0, %c0_0] : memref<16x8xf32, #tpu.memory_space<vmem>>, vector<16x8xf32>
    %1 = arith.truncf %0 : vector<16x8xf32> to vector<16x8xbf16>
    %c0_1 = arith.constant 0 : index
    %c0_2 = arith.constant 0 : index
    %2 = vector.load %arg2[%c0_1, %c0_2] : memref<8x128xbf16, #tpu.memory_space<vmem>>, vector<8x128xbf16>
    %cst = arith.constant dense<0.000000e+00> : vector<16x128xf32>
    %3 = tpu.matmul %1, %2, %cst {dimension_numbers = #tpu.dot_dimension_numbers<[1], [0], [0], [1], [0, 0, 1, 1], [], []>} : vector<16x8xbf16>, vector<8x128xbf16>, vector<16x128xf32> -> vector<16x128xf32>
    %c0_3 = arith.constant 0 : index
    %c0_4 = arith.constant 0 : index
    %4 = vector.load %arg3[%c0_3, %c0_4] : memref<1x128xf32, #tpu.memory_space<vmem>>, vector<1x128xf32>
    %5 = vector.broadcast %4 : vector<1x128xf32> to vector<16x128xf32>
    %6 = arith.addf %3, %5 : vector<16x128xf32>
    %cst_5 = arith.constant 0.000000e+00 : f32
    %7 = vector.broadcast %cst_5 : f32 to vector<16x128xf32>
    %8 = arith.maximumf %6, %7 : vector<16x128xf32>
    %9 = arith.truncf %8 : vector<16x128xf32> to vector<16x128xbf16>
    %c0_6 = arith.constant 0 : index
    %c0_7 = arith.constant 0 : index
    %10 = vector.load %arg4[%c0_6, %c0_7] : memref<128x128xbf16, #tpu.memory_space<vmem>>, vector<128x128xbf16>
    %cst_8 = arith.constant dense<0.000000e+00> : vector<16x128xf32>
    %11 = tpu.matmul %9, %10, %cst_8 {dimension_numbers = #tpu.dot_dimension_numbers<[1], [0], [0], [1], [0, 0, 1, 1], [], []>} : vector<16x128xbf16>, vector<128x128xbf16>, vector<16x128xf32> -> vector<16x128xf32>
    %c0_9 = arith.constant 0 : index
    %c0_10 = arith.constant 0 : index
    %12 = vector.load %arg5[%c0_9, %c0_10] : memref<1x128xf32, #tpu.memory_space<vmem>>, vector<1x128xf32>
    %13 = vector.broadcast %12 : vector<1x128xf32> to vector<16x128xf32>
    %14 = arith.addf %11, %13 : vector<16x128xf32>
    %cst_11 = arith.constant 0.000000e+00 : f32
    %15 = vector.broadcast %cst_11 : f32 to vector<16x128xf32>
    %16 = arith.maximumf %14, %15 : vector<16x128xf32>
    %17 = arith.truncf %16 : vector<16x128xf32> to vector<16x128xbf16>
    %c0_12 = arith.constant 0 : index
    %c0_13 = arith.constant 0 : index
    %18 = vector.load %arg6[%c0_12, %c0_13] : memref<128x4xbf16, #tpu.memory_space<vmem>>, vector<128x4xbf16>
    %cst_14 = arith.constant dense<0.000000e+00> : vector<16x4xf32>
    %19 = tpu.matmul %17, %18, %cst_14 {dimension_numbers = #tpu.dot_dimension_numbers<[1], [0], [0], [1], [0, 0, 1, 1], [], []>} : vector<16x128xbf16>, vector<128x4xbf16>, vector<16x4xf32> -> vector<16x4xf32>
    %c0_15 = arith.constant 0 : index
    %c0_16 = arith.constant 0 : index
    %20 = vector.load %arg7[%c0_15, %c0_16] : memref<1x4xf32, #tpu.memory_space<vmem>>, vector<1x4xf32>
    %21 = vector.broadcast %20 : vector<1x4xf32> to vector<16x4xf32>
    %22 = arith.addf %19, %21 : vector<16x4xf32>
    %c0_17 = arith.constant 0 : index
    %c0_18 = arith.constant 0 : index
    %23 = vector.load %arg8[%c0_17, %c0_18] : memref<16x4xf32, #tpu.memory_space<vmem>>, vector<16x4xf32>
    tpu.vector_store %arg8[%c0_17, %c0_18], %22 {strides = array<i32>} : memref<16x4xf32, #tpu.memory_space<vmem>>, vector<16x4xf32>,
    return
  }
  func.func @transform_0(%arg0: i32) -> (i32, i32) {
    %c0_i32 = arith.constant 0 : i32
    %c0_i32_0 = arith.constant 0 : i32
    return %arg0, %c0_i32 : i32, i32
  }
  func.func @transform_1(%arg0: i32) -> (i32, i32) {
    %c0_i32 = arith.constant 0 : i32
    %c0_i32_0 = arith.constant 0 : i32
    %c0_i32_1 = arith.constant 0 : i32
    return %c0_i32, %c0_i32_0 : i32, i32
  }
  func.func @transform_2(%arg0: i32) -> (i32, i32) {
    %c0_i32 = arith.constant 0 : i32
    %c0_i32_0 = arith.constant 0 : i32
    %c0_i32_1 = arith.constant 0 : i32
    return %c0_i32, %c0_i32_0 : i32, i32
  }
  func.func @transform_3(%arg0: i32) -> (i32, i32) {
    %c0_i32 = arith.constant 0 : i32
    %c0_i32_0 = arith.constant 0 : i32
    %c0_i32_1 = arith.constant 0 : i32
    return %c0_i32, %c0_i32_0 : i32, i32
  }
  func.func @transform_4(%arg0: i32) -> (i32, i32) {
    %c0_i32 = arith.constant 0 : i32
    %c0_i32_0 = arith.constant 0 : i32
    %c0_i32_1 = arith.constant 0 : i32
    return %c0_i32, %c0_i32_0 : i32, i32
  }
  func.func @transform_5(%arg0: i32) -> (i32, i32) {
    %c0_i32 = arith.constant 0 : i32
    %c0_i32_0 = arith.constant 0 : i32
    %c0_i32_1 = arith.constant 0 : i32
    return %c0_i32, %c0_i32_0 : i32, i32
  }
  func.func @transform_6(%arg0: i32) -> (i32, i32) {
    %c0_i32 = arith.constant 0 : i32
    %c0_i32_0 = arith.constant 0 : i32
    %c0_i32_1 = arith.constant 0 : i32
    return %c0_i32, %c0_i32_0 : i32, i32
  }
  func.func @transform_7(%arg0: i32) -> (i32, i32) {
    %c0_i32 = arith.constant 0 : i32
    %c0_i32_0 = arith.constant 0 : i32
    return %arg0, %c0_i32 : i32, i32
  }
}

</mosaic_0001>

<bundles_post_ra>
// kernel: mlp_forward.1
= control target key start
LH: loop header
LB: loop body
LE: loop exit
PB: predicated region body
PF: predicated region fallthrough
CT: control target
= control target key end

     0   :  { %vm42_vm0 = vcmask 1043456   ;;  %v428_v0 = vmov 0.0   ;;  %vm429_vm1 = vmmov 0   ;;  %vm38_vm2 = vcmask 64512   ;;  %s565_s1 = inlined_call_operand.vmem [shape: bf16[8,128], index: 1, kind: input, shape index: {}]   ;;  %s566_s0 = inlined_call_operand.vmem [shape: f32[16,8], index: 0, kind: input, shape index: {}]   ;;  %s567_s3 = inlined_call_operand.vmem [shape: bf16[128,128], index: 3, kind: input, shape index: {}]   ;;  %s568_s5 = inlined_call_operand.vmem [shape: bf16[128,4], index: 5, kind: input, shape index: {}]   ;;  %s569_s2 = inlined_call_operand.vmem [shape: f32[1,128], index: 2, kind: input, shape index: {}]   ;;  %s570_s4 = inlined_call_operand.vmem [shape: f32[1,128], index: 4, kind: input, shape index: {}]   ;;  %s571_s6 = inlined_call_operand.vmem [shape: f32[1,4], index: 6, kind: input, shape index: {}]   ;;  %s572_s7 = inlined_call_operand.vmem [shape: f32[16,4], index: 7, kind: output, shape index: {}]  }
   0x1   :  { %364 = vmatprep.subr.bf16.mxu0 %v428_v0  ;;  %v30_v1 = vld [vmem:[%s565_s1] sm:$0xf]  ;;  %366 = vmatprep.mubr.msk.bf16.mxu0 %vm429_vm1, %v428_v0  ;;  %v28_v3 = vld [vmem:[%s566_s0 + $0x8] sm:$0xff]  ;;  %v414_v8 = vld [vmem:[%s567_s3 + $0x10] sm:$0xff]   ;;  %vm317_vm3 = vcmask 31744  }
   0x2   :  { %v27_v2 = vld [vmem:[%s566_s0] sm:$0xff]  ;;  %v44_v4 = vsel %vm42_vm0, %v30_v1, 0  ;;  %370 = vmatprep.subr.bf16.mxu1 %v428_v0  ;;  %386 = vmatprep.mubr.msk.bf16.mxu1 %vm429_vm1, %v428_v0  ;;  %v413_v7 = vld [vmem:[%s567_s3 + $0x8] sm:$0xff]   ;;  %v415_v9 = vld [vmem:[%s567_s3 + $0x18] sm:$0xff]  }
   0x3   :  { %v29_v5 = vpack.c.bf16 %v28_v3, %v27_v2  ;;  %v412_v6 = vld [vmem:[%s567_s3] sm:$0xff]   ;;  %365 = vmatpush3.bf16.msra.mxu0 %v44_v4  ;;  %v417_v11 = vld [vmem:[%s567_s3 + $0x28] sm:$0xff]   ;;  %v418_v12 = vld [vmem:[%s567_s3 + $0x30] sm:$0xff]  }
   0x4   :  { %371 = vmatpush3.bf16.msra.mxu1 %v412_v6  ;;  %390 = vmatprep.subr.bf16.mxu0 %v428_v0  ;;  %v416_v10 = vld [vmem:[%s567_s3 + $0x20] sm:$0xff]   ;;  %v419_v13 = vld [vmem:[%s567_s3 + $0x38] sm:$0xff]   ;;  %v421_v15 = vld [vmem:[%s568_s5 + $0x8] sm:$0xff]  }
   0x5   :  { %372 = vmatprep.subr.bf16.mxu1 %v428_v0  ;;  %v420_v14 = vld [vmem:[%s568_s5] sm:$0xff]   ;;  %v422_v16 = vld [vmem:[%s568_s5 + $0x10] sm:$0xff]   ;;  %v423_v17 = vld [vmem:[%s568_s5 + $0x18] sm:$0xff]  }
   0x6   :  { %367 = vmatmul.mubr.msk.bf16.vlgmr.msra.gmra.mrb[0].mxu0 %vm38_vm2, %v29_v5  ;;  %v424_v18 = vld [vmem:[%s568_s5 + $0x20] sm:$0xff]   ;;  %v425_v19 = vld [vmem:[%s568_s5 + $0x28] sm:$0xff]   ;;  %v426_v30 = vld [vmem:[%s568_s5 + $0x30] sm:$0xff]  }
   0x7   :  { %406 = vmatprep.mubr.msk.bf16.mxu0 %vm429_vm1, %v428_v0  ;;  %391 = vmatpush3.bf16.msra.mxu0 %v420_v14  ;;  %v324_v20 = vld [vmem:[%s569_s2] ss:$0 sm:$0xff]  ;;  %v427_v31 = vld [vmem:[%s568_s5 + $0x38] sm:$0xff]  }
   0x8   :  { %373 = vmatpush3.bf16.msra.mxu1 %v413_v7  ;;  %392 = vmatprep.subr.bf16.mxu0 %v428_v0  ;;  %v326_v32 = vld [vmem:[%s570_s4] ss:$0 sm:$0xff] }
   0x9   :  { %374 = vmatprep.subr.bf16.mxu1 %v428_v0  ;;  %v335_v42 = vld [vmem:[%s571_s6] ss:$0 sm:$0xff] }
   0xb   :  { %393 = vmatpush3.bf16.msra.mxu0 %v421_v15 }
   0xc   :  { %375 = vmatpush3.bf16.msra.mxu1 %v414_v8  ;;  %394 = vmatprep.subr.bf16.mxu0 %v428_v0 }
   0xd   :  { %376 = vmatprep.subr.bf16.mxu1 %v428_v0 }
   0xf   :  { %395 = vmatpush3.bf16.msra.mxu0 %v422_v16 }
  0x10   :  { %377 = vmatpush3.bf16.msra.mxu1 %v415_v9  ;;  %396 = vmatprep.subr.bf16.mxu0 %v428_v0 }
  0x11   :  { %378 = vmatprep.subr.bf16.mxu1 %v428_v0 }
  0x13   :  { %397 = vmatpush3.bf16.msra.mxu0 %v423_v17 }
  0x14   :  { %379 = vmatpush3.bf16.msra.mxu1 %v416_v10  ;;  %398 = vmatprep.subr.bf16.mxu0 %v428_v0 }
  0x15   :  { %380 = vmatprep.subr.bf16.mxu1 %v428_v0 }
  0x17   :  { %399 = vmatpush3.bf16.msra.mxu0 %v424_v18 }
  0x18   :  { %381 = vmatpush3.bf16.msra.mxu1 %v417_v11  ;;  %400 = vmatprep.subr.bf16.mxu0 %v428_v0 }
  0x19   :  { %382 = vmatprep.subr.bf16.mxu1 %v428_v0 }
  0x1b   :  { %401 = vmatpush3.bf16.msra.mxu0 %v425_v19 }
  0x1c   :  { %383 = vmatpush3.bf16.msra.mxu1 %v418_v12  ;;  %402 = vmatprep.subr.bf16.mxu0 %v428_v0 }
  0x1d   :  { %384 = vmatprep.subr.bf16.mxu1 %v428_v0 }
  0x1f   :  { %403 = vmatpush3.bf16.msra.mxu0 %v426_v30 }
  0x20   :  { %385 = vmatpush3.bf16.msra.mxu1 %v419_v13  ;;  %404 = vmatprep.subr.bf16.mxu0 %v428_v0 }
  0x23   :  { %405 = vmatpush3.bf16.msra.mxu0 %v427_v31 }
  0xd9   :  { %v80_v21 = vpop.f32.mrb[0].mxu0 }
  0xda   :  { %v81_v22 = vadd.f32 %v324_v20, %v80_v21  ;;  %v368_v23 = vpop.f32.mrb[1].mxu0 }
  0xdb   :  { %v83_v24 = vpop.f32.mrb[2].mxu0 }
  0xdc   :  { %v84_v25 = vadd.f32 %v324_v20, %v83_v24  ;;  %v369_v26 = vpop.f32.mrb[3].mxu0  ;;  %v87_v27 = vmax.f32 %v81_v22, 0.0 }
  0xde   :  { %v88_v28 = vmax.f32 %v84_v25, 0.0 }
  0xe0   :  { %v89_v29 = vpack.c.bf16 %v88_v28, %v87_v27 }
  0xe2   :  { %387 = vmatmul.mubr.bf16.vlgmr.msra.gmra.mrb[0].mxu1 %v89_v29 }
 0x1b5   :  { %v195_v33 = vpop.f32.mrb[0].mxu1 }
 0x1b6   :  { %v196_v34 = vadd.f32 %v326_v32, %v195_v33  ;;  %v388_v35 = vpop.f32.mrb[1].mxu1 }
 0x1b7   :  { %v198_v36 = vpop.f32.mrb[2].mxu1 }
 0x1b8   :  { %v199_v37 = vadd.f32 %v326_v32, %v198_v36  ;;  %v389_v38 = vpop.f32.mrb[3].mxu1  ;;  %v202_v39 = vmax.f32 %v196_v34, 0.0 }
 0x1ba   :  { %v203_v40 = vmax.f32 %v199_v37, 0.0 }
 0x1bc   :  { %v204_v41 = vpack.c.bf16 %v203_v40, %v202_v39 }
 0x1be   :  { %407 = vmatmul.mubr.bf16.vlgmr.msra.gmra.mrb[4].mxu0 %v204_v41 }
 0x291   :  { %v310_v43 = vpop.f32.mrb[4].mxu0 }
 0x292   :  { %v311_v44 = vadd.f32 %v335_v42, %v310_v43  ;;  %v408_v45 = vpop.f32.mrb[5].mxu0 }
 0x293   :  { %v313_v46 = vpop.f32.mrb[6].mxu0 }
 0x294   :  { %318 = vst.msk [vmem:[%s572_s7] sm:$0xff] %vm317_vm3, %v311_v44  ;;  %v314_v47 = vadd.f32 %v335_v42, %v313_v46  ;;  %v409_v48 = vpop.f32.mrb[7].mxu0 }
 0x296   :  { %319 = vst.msk [vmem:[%s572_s7 + $0x8] sm:$0xff] %vm317_vm3, %v314_v47 }

</bundles_post_ra>
